<compile_context>
chip_gen: v5e
topology: v5e:2x2
jax: 0.10.0
libtpu: 0.0.40
codegen_flags: <defaults>
</compile_context>

<pallas_src>
import functools

import jax
import jax.numpy as jnp
from jax.experimental import pallas as pl
from jax.experimental.pallas import tpu as pltpu


def _round_up(x, m):
    return ((x + m - 1) // m) * m


def _gate_unit_kernel(m_ref, q_ref, h_ref,
                      wg_m_ref, wg_q_ref, wg_h_ref,
                      wt_m_ref, wt_rh_ref,
                      bg_ref, bt_ref,
                      out_ref):
    """One batch-column tile, transposed layout.

    m_ref/q_ref/h_ref : (H, TB)   activations, batch on the lane axis
    wg_*_ref          : (H, H)    W_gate^T split by input block
    wt_m_ref/wt_rh_ref: (H, H)    W_trans^T split by input block
    bg_ref/bt_ref     : (H, 1)    biases (broadcast over lanes)
    out_ref           : (H, TB)   lane-dense output tile
    """
    f32 = jnp.float32

    # reset^T = sigmoid(Wg_m @ m^T + Wg_q @ q^T + Wg_h @ h^T + bg)
    gate_pre = (
        jnp.dot(wg_m_ref[...], m_ref[...], preferred_element_type=f32)
        + jnp.dot(wg_q_ref[...], q_ref[...], preferred_element_type=f32)
        + jnp.dot(wg_h_ref[...], h_ref[...], preferred_element_type=f32)
        + bg_ref[...]
    )
    gate = jax.nn.sigmoid(gate_pre)                       # (H, TB) f32

    # out^T = tanh(Wt_m @ m^T + Wt_rh @ (gate * h)^T + bt)
    gated_h = (gate * h_ref[...].astype(f32)).astype(wt_rh_ref.dtype)
    cand = (
        jnp.dot(wt_m_ref[...], m_ref[...], preferred_element_type=f32)
        + jnp.dot(wt_rh_ref[...], gated_h, preferred_element_type=f32)
        + bt_ref[...]
    )
    out_ref[...] = jnp.tanh(cand).astype(out_ref.dtype)


def pack_params(params, compute_dtype=jnp.float32):
    """Hoisted, once-per-model weight preparation (NOT per forward call).

    Input layout (as in the torch module, stored transposed in->out):
      W_gate (3H, H), b_gate (1, H), W_trans (2H, H), b_trans (1, H).
    Output: transposed (out, in) H x H blocks + (H, 1) biases.
    """
    H = params["b_gate"].shape[-1]
    wg_t = params["W_gate"].T.astype(compute_dtype)    # (H, 3H)
    wt_t = params["W_trans"].T.astype(compute_dtype)   # (H, 2H)
    return {
        "wg_m": wg_t[:, :H], "wg_q": wg_t[:, H:2 * H], "wg_h": wg_t[:, 2 * H:],
        "wt_m": wt_t[:, :H], "wt_rh": wt_t[:, H:],
        "bg": params["b_gate"].reshape(H, 1).astype(jnp.float32),
        "bt": params["b_trans"].reshape(H, 1).astype(jnp.float32),
    }


def gate_unit_forward(message, query_r, hidden_state, packed,
                      block_cols=2048, compute_dtype=jnp.float32):
    """Pallas forward.  `packed` is the output of pack_params()."""
    B, H = message.shape

    # Layout plumbing: present batch as the lane (last) axis.
    mT = message.T.astype(compute_dtype)        # (H, B)
    qT = query_r.T.astype(compute_dtype)
    hT = hidden_state.T.astype(compute_dtype)

    # Batch tile: multiple of 128 lanes, clamped so the grid keeps >= 2 steps
    # (v7x has 2 TensorCores; a 1-step grid leaves half the chip idle).
    if B <= 128:
        tb = B
    else:
        half = _round_up(pl.cdiv(B, 2), 128)
        tb = max(128, min(_round_up(block_cols, 128), half))
    grid = (pl.cdiv(B, tb),)

    act_spec = pl.BlockSpec((H, tb), lambda i: (0, i))       # streamed tiles
    w_spec = pl.BlockSpec((H, H), lambda i: (0, 0))          # resident weights
    b_spec = pl.BlockSpec((H, 1), lambda i: (0, 0))          # resident biases

    out_T = pl.pallas_call(
        _gate_unit_kernel,
        grid=grid,
        in_specs=[act_spec, act_spec, act_spec,
                  w_spec, w_spec, w_spec,
                  w_spec, w_spec,
                  b_spec, b_spec],
        out_specs=pl.BlockSpec((H, tb), lambda i: (0, i)),
        out_shape=jax.ShapeDtypeStruct((H, B), jnp.float32),
        compiler_params=pltpu.CompilerParams(
            dimension_semantics=("parallel",)),
    )(mT, qT, hT,
      packed["wg_m"], packed["wg_q"], packed["wg_h"],
      packed["wt_m"], packed["wt_rh"],
      packed["bg"], packed["bt"])

    return out_T.T                                            # (B, H)


def reference_forward(message, query_r, hidden_state, params):
    """Pure-JAX reference matching the torch module."""
    x3 = jnp.concatenate([message, query_r, hidden_state], axis=1)
    reset = jax.nn.sigmoid(x3 @ params["W_gate"] + params["b_gate"])
    x2 = jnp.concatenate([message, reset * hidden_state], axis=1)
    return jnp.tanh(x2 @ params["W_trans"] + params["b_trans"])


if __name__ == "__main__":
    # hidden_size=32, batch=256 -> tb=128, grid of 2 parallel steps.
    B, H = 256, 32

    key = jax.random.PRNGKey(0)
    ks = jax.random.split(key, 8)

    params = {
        "W_gate": jax.random.normal(ks[0], (3 * H, H), jnp.float32) * 0.1,
        "b_gate": jax.random.normal(ks[1], (1, H), jnp.float32) * 0.1,
        "W_trans": jax.random.normal(ks[2], (2 * H, H), jnp.float32) * 0.1,
        "b_trans": jax.random.normal(ks[3], (1, H), jnp.float32) * 0.1,
    }

    message = jax.random.normal(ks[4], (B, H), jnp.float32)
    query_r = jax.random.normal(ks[5], (B, H), jnp.float32)
    hidden_state = jax.random.normal(ks[6], (B, H), jnp.float32)

    packed = pack_params(params)                 # hoisted out of forward path
    fwd = jax.jit(functools.partial(gate_unit_forward, packed=packed))

    out = jax.block_until_ready(fwd(message, query_r, hidden_state))

    ref = reference_forward(message, query_r, hidden_state, params)
    assert out.shape == (B, H)
    assert jnp.allclose(out, ref, atol=1e-4, rtol=1e-4), "mismatch vs JAX reference"

    print("KERNEL_OK")
</pallas_src>

<mosaic_0001>
module attributes {stable_mosaic.version = 11 : i64} {
  func.func @_gate_unit_kernel(%arg0: i32, %arg1: memref<32x128xf32, #tpu.memory_space<vmem>>, %arg2: memref<32x128xf32, #tpu.memory_space<vmem>>, %arg3: memref<32x128xf32, #tpu.memory_space<vmem>>, %arg4: memref<32x32xf32, #tpu.memory_space<vmem>>, %arg5: memref<32x32xf32, #tpu.memory_space<vmem>>, %arg6: memref<32x32xf32, #tpu.memory_space<vmem>>, %arg7: memref<32x32xf32, #tpu.memory_space<vmem>>, %arg8: memref<32x32xf32, #tpu.memory_space<vmem>>, %arg9: memref<32x1xf32, #tpu.memory_space<vmem>>, %arg10: memref<32x1xf32, #tpu.memory_space<vmem>>, %arg11: memref<32x128xf32, #tpu.memory_space<vmem>>) attributes {dimension_semantics = [#tpu.dimension_semantics<parallel>], iteration_bounds = array<i64: 2>, scalar_prefetch = 0 : i64, scratch_operands = 0 : i64, tpu.core_type = #tpu.core_type<tc>, window_params = [{transform_indices = @transform_0, window_bounds = array<i64: 32, 128>}, {transform_indices = @transform_1, window_bounds = array<i64: 32, 128>}, {transform_indices = @transform_2, window_bounds = array<i64: 32, 128>}, {pipeline_mode = #tpu.pipeline_mode<synchronous>, transform_indices = @transform_3, window_bounds = array<i64: 32, 32>}, {pipeline_mode = #tpu.pipeline_mode<synchronous>, transform_indices = @transform_4, window_bounds = array<i64: 32, 32>}, {pipeline_mode = #tpu.pipeline_mode<synchronous>, transform_indices = @transform_5, window_bounds = array<i64: 32, 32>}, {pipeline_mode = #tpu.pipeline_mode<synchronous>, transform_indices = @transform_6, window_bounds = array<i64: 32, 32>}, {pipeline_mode = #tpu.pipeline_mode<synchronous>, transform_indices = @transform_7, window_bounds = array<i64: 32, 32>}, {pipeline_mode = #tpu.pipeline_mode<synchronous>, transform_indices = @transform_8, window_bounds = array<i64: 32, 1>}, {pipeline_mode = #tpu.pipeline_mode<synchronous>, transform_indices = @transform_9, window_bounds = array<i64: 32, 1>}, {transform_indices = @transform_10, window_bounds = array<i64: 32, 128>}]} {
    %c0 = arith.constant 0 : index
    %c0_0 = arith.constant 0 : index
    %0 = vector.load %arg4[%c0, %c0_0] : memref<32x32xf32, #tpu.memory_space<vmem>>, vector<32x32xf32>
    %c0_1 = arith.constant 0 : index
    %c0_2 = arith.constant 0 : index
    %1 = vector.load %arg1[%c0_1, %c0_2] : memref<32x128xf32, #tpu.memory_space<vmem>>, vector<32x128xf32>
    %cst = arith.constant dense<0.000000e+00> : vector<32x128xf32>
    %2 = tpu.matmul %0, %1, %cst {dimension_numbers = #tpu.dot_dimension_numbers<[1], [0], [0], [1], [0, 0, 1, 1], [], []>} : vector<32x32xf32>, vector<32x128xf32>, vector<32x128xf32> -> vector<32x128xf32>
    %c0_3 = arith.constant 0 : index
    %c0_4 = arith.constant 0 : index
    %3 = vector.load %arg5[%c0_3, %c0_4] : memref<32x32xf32, #tpu.memory_space<vmem>>, vector<32x32xf32>
    %c0_5 = arith.constant 0 : index
    %c0_6 = arith.constant 0 : index
    %4 = vector.load %arg2[%c0_5, %c0_6] : memref<32x128xf32, #tpu.memory_space<vmem>>, vector<32x128xf32>
    %cst_7 = arith.constant dense<0.000000e+00> : vector<32x128xf32>
    %5 = tpu.matmul %3, %4, %cst_7 {dimension_numbers = #tpu.dot_dimension_numbers<[1], [0], [0], [1], [0, 0, 1, 1], [], []>} : vector<32x32xf32>, vector<32x128xf32>, vector<32x128xf32> -> vector<32x128xf32>
    %6 = arith.addf %2, %5 : vector<32x128xf32>
    %c0_8 = arith.constant 0 : index
    %c0_9 = arith.constant 0 : index
    %7 = vector.load %arg6[%c0_8, %c0_9] : memref<32x32xf32, #tpu.memory_space<vmem>>, vector<32x32xf32>
    %c0_10 = arith.constant 0 : index
    %c0_11 = arith.constant 0 : index
    %8 = vector.load %arg3[%c0_10, %c0_11] : memref<32x128xf32, #tpu.memory_space<vmem>>, vector<32x128xf32>
    %cst_12 = arith.constant dense<0.000000e+00> : vector<32x128xf32>
    %9 = tpu.matmul %7, %8, %cst_12 {dimension_numbers = #tpu.dot_dimension_numbers<[1], [0], [0], [1], [0, 0, 1, 1], [], []>} : vector<32x32xf32>, vector<32x128xf32>, vector<32x128xf32> -> vector<32x128xf32>
    %10 = arith.addf %6, %9 : vector<32x128xf32>
    %c0_13 = arith.constant 0 : index
    %c0_14 = arith.constant 0 : index
    %11 = vector.load %arg9[%c0_13, %c0_14] : memref<32x1xf32, #tpu.memory_space<vmem>>, vector<32x1xf32>
    %12 = vector.broadcast %11 : vector<32x1xf32> to vector<32x128xf32>
    %13 = arith.addf %10, %12 : vector<32x128xf32>
    %14 = arith.negf %13 : vector<32x128xf32>
    %15 = math.exp %14 : vector<32x128xf32>
    %cst_15 = arith.constant 1.000000e+00 : f32
    %16 = vector.broadcast %cst_15 : f32 to vector<32x128xf32>
    %17 = arith.addf %16, %15 : vector<32x128xf32>
    %18 = arith.divf %16, %17 : vector<32x128xf32>
    %c0_16 = arith.constant 0 : index
    %c0_17 = arith.constant 0 : index
    %19 = vector.load %arg3[%c0_16, %c0_17] : memref<32x128xf32, #tpu.memory_space<vmem>>, vector<32x128xf32>
    %20 = arith.mulf %18, %19 : vector<32x128xf32>
    %c0_18 = arith.constant 0 : index
    %c0_19 = arith.constant 0 : index
    %21 = vector.load %arg7[%c0_18, %c0_19] : memref<32x32xf32, #tpu.memory_space<vmem>>, vector<32x32xf32>
    %c0_20 = arith.constant 0 : index
    %c0_21 = arith.constant 0 : index
    %22 = vector.load %arg1[%c0_20, %c0_21] : memref<32x128xf32, #tpu.memory_space<vmem>>, vector<32x128xf32>
    %cst_22 = arith.constant dense<0.000000e+00> : vector<32x128xf32>
    %23 = tpu.matmul %21, %22, %cst_22 {dimension_numbers = #tpu.dot_dimension_numbers<[1], [0], [0], [1], [0, 0, 1, 1], [], []>} : vector<32x32xf32>, vector<32x128xf32>, vector<32x128xf32> -> vector<32x128xf32>
    %c0_23 = arith.constant 0 : index
    %c0_24 = arith.constant 0 : index
    %24 = vector.load %arg8[%c0_23, %c0_24] : memref<32x32xf32, #tpu.memory_space<vmem>>, vector<32x32xf32>
    %cst_25 = arith.constant dense<0.000000e+00> : vector<32x128xf32>
    %25 = tpu.matmul %24, %20, %cst_25 {dimension_numbers = #tpu.dot_dimension_numbers<[1], [0], [0], [1], [0, 0, 1, 1], [], []>} : vector<32x32xf32>, vector<32x128xf32>, vector<32x128xf32> -> vector<32x128xf32>
    %26 = arith.addf %23, %25 : vector<32x128xf32>
    %c0_26 = arith.constant 0 : index
    %c0_27 = arith.constant 0 : index
    %27 = vector.load %arg10[%c0_26, %c0_27] : memref<32x1xf32, #tpu.memory_space<vmem>>, vector<32x1xf32>
    %28 = vector.broadcast %27 : vector<32x1xf32> to vector<32x128xf32>
    %29 = arith.addf %26, %28 : vector<32x128xf32>
    %30 = math.tanh %29 : vector<32x128xf32>
    %c0_28 = arith.constant 0 : index
    %c0_29 = arith.constant 0 : index
    %31 = vector.load %arg11[%c0_28, %c0_29] : memref<32x128xf32, #tpu.memory_space<vmem>>, vector<32x128xf32>
    tpu.vector_store %arg11[%c0_28, %c0_29], %30 {strides = array<i32>} : memref<32x128xf32, #tpu.memory_space<vmem>>, vector<32x128xf32>,
    return
  }
  func.func @transform_0(%arg0: i32) -> (i32, i32) {
    %c0_i32 = arith.constant 0 : i32
    %c0_i32_0 = arith.constant 0 : i32
    return %c0_i32, %arg0 : i32, i32
  }
  func.func @transform_1(%arg0: i32) -> (i32, i32) {
    %c0_i32 = arith.constant 0 : i32
    %c0_i32_0 = arith.constant 0 : i32
    return %c0_i32, %arg0 : i32, i32
  }
  func.func @transform_2(%arg0: i32) -> (i32, i32) {
    %c0_i32 = arith.constant 0 : i32
    %c0_i32_0 = arith.constant 0 : i32
    return %c0_i32, %arg0 : i32, i32
  }
  func.func @transform_3(%arg0: i32) -> (i32, i32) {
    %c0_i32 = arith.constant 0 : i32
    %c0_i32_0 = arith.constant 0 : i32
    %c0_i32_1 = arith.constant 0 : i32
    return %c0_i32, %c0_i32_0 : i32, i32
  }
  func.func @transform_4(%arg0: i32) -> (i32, i32) {
    %c0_i32 = arith.constant 0 : i32
    %c0_i32_0 = arith.constant 0 : i32
    %c0_i32_1 = arith.constant 0 : i32
    return %c0_i32, %c0_i32_0 : i32, i32
  }
  func.func @transform_5(%arg0: i32) -> (i32, i32) {
    %c0_i32 = arith.constant 0 : i32
    %c0_i32_0 = arith.constant 0 : i32
    %c0_i32_1 = arith.constant 0 : i32
    return %c0_i32, %c0_i32_0 : i32, i32
  }
  func.func @transform_6(%arg0: i32) -> (i32, i32) {
    %c0_i32 = arith.constant 0 : i32
    %c0_i32_0 = arith.constant 0 : i32
    %c0_i32_1 = arith.constant 0 : i32
    return %c0_i32, %c0_i32_0 : i32, i32
  }
  func.func @transform_7(%arg0: i32) -> (i32, i32) {
    %c0_i32 = arith.constant 0 : i32
    %c0_i32_0 = arith.constant 0 : i32
    %c0_i32_1 = arith.constant 0 : i32
    return %c0_i32, %c0_i32_0 : i32, i32
  }
  func.func @transform_8(%arg0: i32) -> (i32, i32) {
    %c0_i32 = arith.constant 0 : i32
    %c0_i32_0 = arith.constant 0 : i32
    %c0_i32_1 = arith.constant 0 : i32
    return %c0_i32, %c0_i32_0 : i32, i32
  }
  func.func @transform_9(%arg0: i32) -> (i32, i32) {
    %c0_i32 = arith.constant 0 : i32
    %c0_i32_0 = arith.constant 0 : i32
    %c0_i32_1 = arith.constant 0 : i32
    return %c0_i32, %c0_i32_0 : i32, i32
  }
  func.func @transform_10(%arg0: i32) -> (i32, i32) {
    %c0_i32 = arith.constant 0 : i32
    %c0_i32_0 = arith.constant 0 : i32
    return %c0_i32, %arg0 : i32, i32
  }
}

</mosaic_0001>

<bundles_post_ra>
// kernel: gate_unit_forward.1
= control target key start
LH: loop header
LB: loop body
LE: loop exit
PB: predicated region body
PF: predicated region fallthrough
CT: control target
= control target key end

     0   :  { %s2205_s0 = inlined_call_operand.hbm [shape: f32[32,256], index: 0, kind: input, shape index: {}]   ;;  %s2206_s1 = inlined_call_operand.hbm [shape: f32[32,256], index: 1, kind: input, shape index: {}]   ;;  %s2207_s2 = inlined_call_operand.hbm [shape: f32[32,256], index: 2, kind: input, shape index: {}]   ;;  %s2208_s3 = inlined_call_operand.hbm [shape: f32[32,32], index: 3, kind: input, shape index: {}]   ;;  %s2209_s4 = inlined_call_operand.hbm [shape: f32[32,32], index: 4, kind: input, shape index: {}]   ;;  %s2210_s5 = inlined_call_operand.hbm [shape: f32[32,32], index: 5, kind: input, shape index: {}]   ;;  %s2211_s6 = inlined_call_operand.hbm [shape: f32[32,32], index: 6, kind: input, shape index: {}]   ;;  %s2212_s7 = inlined_call_operand.hbm [shape: f32[32,32], index: 7, kind: input, shape index: {}]   ;;  %s2213_s8 = inlined_call_operand.hbm [shape: f32[32,1], index: 8, kind: input, shape index: {}]   ;;  %s2214_s9 = inlined_call_operand.hbm [shape: f32[32,1], index: 9, kind: input, shape index: {}]   ;;  %s2215_s10 = inlined_call_operand.hbm [shape: f32[32,256], index: 10, kind: output, shape index: {}]  }
   0x1   :  { %2230 = sst [smem:[#allocation32_spill]] %s2205_s0 }
   0x2   :  { %2231 = sst [smem:[#allocation33_spill]] %s2206_s1 }
   0x3   :  { %2232 = sst [smem:[#allocation34_spill]] %s2208_s3 }
   0x4   :  { %2233 = sst [smem:[#allocation35_spill]] %s2210_s5 }
   0x5   :  { %2234 = sst [smem:[#allocation36_spill]] %s2212_s7 }
   0x6   :  { %2235 = sst [smem:[#allocation37_spill]] %s2215_s10 }
   0x7   :  { %15 = vsyncpa [#allocation3], 0 }
   0x8   :  { %17 = vsyncpa [#allocation3 + $0x1], 0 }
   0x9   :  { %18 = vsyncpa [#allocation6], 0 }
   0xa   :  { %20 = vsyncpa [#allocation6 + $0x1], 0 }
   0xb   :  { %21 = vsyncpa [#allocation9], 0 }
   0xc   :  { %22 = vsyncpa [#allocation12], 0 }
   0xd   :  { %23 = vsyncpa [#allocation15], 0 }
   0xe   :  { %24 = vsyncpa [#allocation18], 0 }
   0xf   :  { %25 = vsyncpa [#allocation4], 0 }
  0x10   :  { %27 = vsyncpa [#allocation4 + $0x1], 0  ;;  %s1844_s13 = smov 0   ;;  %s1846_s14 = smov 0  }
  0x11   :  { %s1848_s15 = smov 0   ;;  %s1850_s16 = smov 0  }
  0x12 LB: > { %2236 = sst [smem:[#allocation27_spill]] %s1761_s13  ;;  %s1868_s20 = sadd.s32 4294967295, %s1773_s16   ;;  %s1773_s16 = sphi %s1850_s16, %s2273_s16   ;;  %s1769_s15 = sphi %s1848_s15, %s2277_s15   ;;  %s1765_s14 = sphi %s1846_s14, %s2276_s14   ;;  %s1761_s13 = sphi %s1844_s13, %s2275_s13  }
  0x13   : > { %2237 = sst [smem:[#allocation28_spill]] %s1773_s16  ;;  %p1159_p0 = scmp.ge.s32.totalorder %s1773_s16, 1 }
  0x14   : > { %s2238_s3 = sld [smem:[#allocation34_spill]]  ;;  %p2224_p1 = scmp.eq.s32.totalorder %s1868_s20, 0 }
  0x15   : > { %p289_p2 = scmp.lt.s32.totalorder %s1773_s16, 3  ;;  %s1775_s22 = smov [#allocation8]  }
  0x16   : > { %s302_s23 = sshll.u32 %s1775_s22, 4  ;;  %s2240_s5 = sld [smem:[#allocation35_spill]]  ;;  %s303_s23 = int_to_ptr.vmem [resolvable:$true] %s302_s23 }
  0x17   : > { %p1873_p3 = pnand %p1159_p0, %p289_p2  ;;  %s2242_s7 = sld [smem:[#allocation36_spill]] }
  0x18   : > { %s1776_s11 = smov [#allocation11]   ;;  %s2216_s17 = smov 128  }
  0x19   : > { %p1262_p4 = pneg %p1873_p3  ;;  %s330_s12 = sshll.u32 %s1776_s11, 4  ;;  %s331_s12 = int_to_ptr.vmem [resolvable:$true] %s330_s12 }
  0x1a   : > { %s300_s19 = sshll.u32 %s2238_s3, 4  ;;  %s2218_s18 = smov 8   ;;  %s301_s19 = int_to_ptr.hbm [resolvable:$true] %s300_s19 }
  0x1b   : > { %p1885_p6 = pnand %p1262_p4, %p2224_p1  ;;  %s1779_s22 = smov [#allocation14]  }
  0x1c   : > { %s328_s26 = sshll.u32 %s2240_s5, 4  ;;  %s358_s24 = sshll.u32 %s1779_s22, 4  ;;  %s329_s26 = int_to_ptr.hbm [resolvable:$true] %s328_s26  ;;  %s359_s24 = int_to_ptr.vmem [resolvable:$true] %s358_s24 }
  0x1d   : > { %s356_s30 = sshll.u32 %s2242_s7, 4  ;;  %s40_s25 = sadd.s32 1, %s1769_s15  ;;  %s357_s30 = int_to_ptr.hbm [resolvable:$true] %s356_s30 }
  0x1e   : > { %1265 = dma.hbm_to_vmem [thread:$0]  (!%p1885_p6), %s301_s19, 512, %s303_s23, [#allocation9], %s2216_s17, %s2216_s17, %s2218_s18  }
  0x1f   : > { %1271 = dma.hbm_to_vmem [thread:$0]  (!%p1885_p6), %s329_s26, 512, %s331_s12, [#allocation12], %s2216_s17, %s2216_s17, %s2218_s18  }
  0x20   : > { %1277 = dma.hbm_to_vmem [thread:$0]  (!%p1885_p6), %s357_s30, 512, %s359_s24, [#allocation15], %s2216_s17, %s2216_s17, %s2218_s18  }
  0x21   : > { %s1158_s19 = sadd.s32 4294967294, %s1773_s16   ;;  %s1909_s23 = sadd.s32 1, %s1773_s16  }
  0x22   : > { %2243 = sst [smem:[#allocation29_spill]] %s1909_s23  ;;  %s37_s28 = ssub.s32 %s1773_s16, %s1909_s23 }
  0x23   : > { %p47_p7 = scmp.ne.s32.totalorder %s1769_s15, %s1765_s14  ;;  %p38_p8 = scmp.eq.s32.totalorder %s37_s28, 0 }
  0x24   : > { %p48_p9 = scmp.eq.s32.totalorder %s1773_s16, 0  ;;  %p53_p10 = scmp.ne.s32.totalorder %s1765_s14, %s1761_s13 }
  0x25   : > { %p276_p11 = scmp.eq.s32.totalorder %s1868_s20, 1  ;;  %p282_p2 = scmp.eq.s32.totalorder %s1158_s19, 1 }
  0x26   : > { %s1921_s26 = scalar_select %p38_p8, %s1769_s15, %s40_s25  }
  0x27   : > { %p49_p12 = por %p48_p9, %p47_p7  ;;  %p1925_p13 = por %p2224_p1, %p53_p10 }
  0x28   : > { %2244 = sst [smem:[#allocation30_spill]] %s1921_s26  ;;  %p1929_p0 = por %p276_p11, %p47_p7 }
  0x29   : > { %p1305_p4 = scmp.lt.s32.totalorder %s1773_s16, 2  ;;  %s2220_s11 = sand.u32 1, %s1769_s15  }
  0x2a   : > { %p1935_p5 = por %p282_p2, %p53_p10  ;;  %s1941_s22 = sshll.u32 %s2220_s11, 5 }
  0x2b   : > { %s1944_s24 = sshll.u32 %s1773_s16, 3  ;;  %p1946_p8 = pnand %p1305_p4, %p49_p12 }
  0x2c   : > { %s2247_s12 = scalar_select %p1935_p5, 1, 0 }
  0x2d   : > { %s421_s19 = sand.u32 1, %s1773_s16   ;;  %s2250_s1 = sld [smem:[#allocation33_spill]] }
  0x2e   : > { %2248 = sst [smem:[#allocation31_spill]] %s2247_s12  ;;  %s425_s5 = scalar_lea.vmem [#allocation5], %s1941_s22 }
  0x2f   : > { %s432_s7 = sshll.u32 %s425_s5, 4  ;;  %s1956_s11 = scalar_lea.sflag [#allocation6], %s421_s19  ;;  %s433_s7 = int_to_ptr.vmem [resolvable:$true] %s432_s7 }
  0x30   : > { %p1481_p9 = pneg %p1946_p8 }
  0x33   : > { %s429_s18 = scalar_lea.hbm %s2250_s1, %s1944_s24 }
  0x34   : > { %s430_s3 = sshll.u32 %s429_s18, 4  ;;  %s1484_s18 = scalar_lea.hbm %s2250_s1, 64  ;;  %s431_s3 = int_to_ptr.hbm [resolvable:$true] %s430_s3 }
  0x35   : > { %s1477_s26 = sshra.s32 %s431_s3, 4  ;;  %s1478_s26 = int_to_ptr.hbm [resolvable:$true] %s1477_s26 }
  0x36   : > { %s1479_s23 = scalar_lea.hbm %s1478_s26, 32  ;;  %p1485_p12 = scmp.lt.s32.totalorder %s1478_s26, %s2250_s1 }
  0x37   : > { %p1480_p7 = scmp.ne.s32.totalorder %s1478_s26, %s1479_s23  ;;  %p1486_p2 = scmp.lt.s32.totalorder %s1484_s18, %s1479_s23 }
  0x39   : > { %p1482_p10 = pnand %p1481_p9, %p1480_p7  ;;  %p1487_p4 = por %p1486_p2, %p1485_p12 }
  0x3b   : > { %p1483_p11 = pneg %p1482_p10 }
  0x3d   : > { %p1488_p1 = pnand %p1487_p4, %p1483_p11 }
  0x3f   : > { %1491 = shalt.err (!%p1488_p1)
}
  0x40   : > { %s2228_s19 = smov 256   ;;  %s2251_s12 = smov 8  }
  0x41   : > { %s2252_s13 = smov 128   ;;  %s314_s10 = sshll.u32 %s2209_s4, 4  ;;  %s315_s10 = int_to_ptr.hbm [resolvable:$true] %s314_s10 }
  0x42   : > { %1290 = dma.hbm_to_vmem [thread:$0]  (!%p1946_p8), %s431_s3, 512, %s433_s7, %s1956_s11, %s2228_s19, %s2252_s13, %s2251_s12  }
  0x43   : > { %s1781_s26 = smov [#allocation10]   ;;  %s342_s5 = sshll.u32 %s2211_s6, 4  ;;  %s343_s5 = int_to_ptr.hbm [resolvable:$true] %s342_s5 }
  0x44   : > { %s316_s23 = sshll.u32 %s1781_s26, 4  ;;  %s1782_s3 = smov [#allocation13]   ;;  %s317_s23 = int_to_ptr.vmem [resolvable:$true] %s316_s23 }
  0x45   : > { %1268 = dma.hbm_to_vmem [thread:$0]  (!%p1885_p6), %s315_s10, 512, %s317_s23, [#allocation9], %s2252_s13, %s2252_s13, %s2251_s12  }
  0x46   : > { %s344_s7 = sshll.u32 %s1782_s3, 4  ;;  %s370_s26 = sshll.u32 %s2213_s8, 4  ;;  %s345_s7 = int_to_ptr.vmem [resolvable:$true] %s344_s7  ;;  %s371_s26 = int_to_ptr.hbm [resolvable:$true] %s370_s26 }
  0x47   : > { %1274 = dma.hbm_to_vmem [thread:$0]  (!%p1885_p6), %s343_s5, 512, %s345_s7, [#allocation12], %s2252_s13, %s2252_s13, %s2251_s12  }
  0x48   : > { %s384_s10 = sshll.u32 %s2214_s9, 4  ;;  %s1783_s23 = smov [#allocation16]   ;;  %s385_s10 = int_to_ptr.hbm [resolvable:$true] %s384_s10 }
  0x49   : > { %s372_s19 = sshll.u32 %s1783_s23, 4  ;;  %s1784_s3 = smov [#allocation17]   ;;  %s373_s19 = int_to_ptr.vmem [resolvable:$true] %s372_s19 }
  0x4a   : > { %1280 = dma.hbm_to_vmem [thread:$0]  (!%p1885_p6), %s371_s26, 512, %s373_s19, [#allocation15], %s2252_s13, %s2252_s13, %s2251_s12  }
  0x4b   : > { %s386_s16 = sshll.u32 %s1784_s3, 4  ;;  %s2253_s0 = sld [smem:[#allocation32_spill]]  ;;  %s387_s16 = int_to_ptr.vmem [resolvable:$true] %s386_s16 }
  0x4c   : > { %1283 = dma.hbm_to_vmem [thread:$0]  (!%p1885_p6), %s385_s10, 512, %s387_s16, [#allocation18], %s2252_s13, %s2252_s13, %s2251_s12  }
  0x4d   : > { %s404_s18 = scalar_lea.vmem [#allocation2], %s1941_s22  ;;  %s2254_s1 = sand.u32 1, %s1769_s15  }
  0x4e   : > { %s411_s28 = sshll.u32 %s404_s18, 4  ;;  %s401_s19 = scalar_lea.sflag [#allocation3], %s2254_s1  ;;  %s412_s28 = int_to_ptr.vmem [resolvable:$true] %s411_s28 }
  0x51   : > { %s408_s17 = scalar_lea.hbm %s2253_s0, %s1944_s24  ;;  %s1634_s16 = scalar_lea.hbm %s2253_s0, 64 }
  0x52   : > { %s409_s23 = sshll.u32 %s408_s17, 4  ;;  %s410_s23 = int_to_ptr.hbm [resolvable:$true] %s409_s23 }
  0x53   : > { %s1627_s26 = sshra.s32 %s410_s23, 4  ;;  %s1628_s26 = int_to_ptr.hbm [resolvable:$true] %s1627_s26 }
  0x54   : > { %s1629_s3 = scalar_lea.hbm %s1628_s26, 32  ;;  %p1635_p6 = scmp.lt.s32.totalorder %s1628_s26, %s2253_s0 }
  0x55   : > { %p1630_p1 = scmp.ne.s32.totalorder %s1628_s26, %s1629_s3  ;;  %p1636_p11 = scmp.lt.s32.totalorder %s1634_s16, %s1629_s3 }
  0x57   : > { %p1632_p7 = pnand %p1630_p1, %p1481_p9  ;;  %p1637_p12 = por %p1636_p11, %p1635_p6 }
  0x59   : > { %p1633_p10 = pneg %p1632_p7 }
  0x5b   : > { %p1638_p2 = pnand %p1637_p12, %p1633_p10 }
  0x5d   : > { %1641 = shalt.err (!%p1638_p2)
}
  0x5e   : > { %s2255_s1 = smov 256   ;;  %s450_s27 = scalar_lea.hbm %s2207_s2, %s1944_s24 }
  0x5f   : > { %1287 = dma.hbm_to_vmem [thread:$0]  (!%p1946_p8), %s410_s23, 512, %s412_s28, %s401_s19, %s2255_s1, %s2252_s13, %s2251_s12  }
  0x60   : > { %s446_s10 = scalar_lea.vmem [#allocation7], %s1941_s22  ;;  %s451_s26 = sshll.u32 %s450_s27, 4  ;;  %s452_s26 = int_to_ptr.hbm [resolvable:$true] %s451_s26 }
  0x61   : > { %s453_s5 = sshll.u32 %s446_s10, 4  ;;  %s1657_s3 = sshra.s32 %s452_s26, 4  ;;  %s454_s5 = int_to_ptr.vmem [resolvable:$true] %s453_s5  ;;  %s1658_s3 = int_to_ptr.hbm [resolvable:$true] %s1657_s3 }
  0x62   : > { %s1659_s16 = scalar_lea.hbm %s1658_s3, 32  ;;  %s1664_s28 = scalar_lea.hbm %s2207_s2, 64 }
  0x63   : > { %p1660_p4 = scmp.ne.s32.totalorder %s1658_s3, %s1659_s16  ;;  %p1665_p10 = scmp.lt.s32.totalorder %s1658_s3, %s2207_s2 }
  0x64   : > { %p1666_p6 = scmp.lt.s32.totalorder %s1664_s28, %s1659_s16 }
  0x65   : > { %p1662_p1 = pnand %p1660_p4, %p1481_p9 }
  0x66   : > { %p1667_p11 = por %p1666_p6, %p1665_p10 }
  0x67   : > { %p1663_p7 = pneg %p1662_p1 }
  0x69   : > { %p1668_p12 = pnand %p1667_p11, %p1663_p7 }
  0x6b   : > { %1671 = shalt.err (!%p1668_p12)
}
  0x6c   : > { %1293 = dma.hbm_to_vmem [thread:$0]  (!%p1946_p8), %s452_s26, 512, %s454_s5, %s1956_s11, %s2255_s1, %s2252_s13, %s2251_s12  }
  0x6d   : > { %465 = sbr.rel (%p1873_p3) target bundleno = 518 (0x206), region = 60  ;;  %s2051_s0 = sand.u32 (!%p1873_p3), 1, %s1765_s14  }
  0x6e   : > { %s2054_s22 = sshll.u32 (!%p1873_p3), %s2051_s0, 5  ;;  %s468_s24 = scalar_lea.sflag (!%p1873_p3), [#allocation3], %s2051_s0 }
  0x6f   : > { %s2058_s17 = scalar_lea.vmem (!%p1873_p3), [#allocation2], %s2054_s22 }
  0x72   : > { %1732 = dma.done.wait (%p1925_p13), %s468_s24, 512  }
  0x73   : > { %1734 = vsyncadd (%p1925_p13), %s468_s24, 4294966784  ;;  %s477_s13 = sand.u32 1, %s1868_s20   ;;  %s481_s11 = scalar_lea.vmem [#allocation5], %s2054_s22 }
  0x74   : > { %s478_s21 = scalar_lea.sflag [#allocation6], %s477_s13 }
  0x75   : > { %1736 = dma.done.wait (%p1925_p13), %s478_s21, 1024  }
  0x76   : > { %1738 = vsyncadd (%p1925_p13), %s478_s21, 4294966272  ;;  %s2071_s12 = scalar_lea.vmem [#allocation7], %s2054_s22  ;;  %p2256_p3 = scmp.eq.s32.totalorder %s1868_s20, 0 }
  0x78   : > { %1740 = dma.done.wait (%p2256_p3), [#allocation9], 1024   ;;  %p2257_p8 = pmov %p2256_p3 }
  0x79   : > { %p2258_p9 = pmov %p2256_p3 }
  0x7a   : > { %1742 = vsyncadd (%p2257_p8), [#allocation9], 4294966272 }
  0x7b   : > { %1744 = dma.done.wait (%p2258_p9), [#allocation12], 1024   ;;  %p2259_p2 = pmov %p2256_p3 }
  0x7d   : > { %1746 = vsyncadd (%p2259_p2), [#allocation12], 4294966272  ;;  %p2260_p4 = pmov %p2259_p2 }
  0x7e   : > { %p2261_p13 = pmov %p2259_p2 }
  0x7f   : > { %1748 = dma.done.wait (%p2260_p4), [#allocation15], 1024  }
  0x80   : > { %1750 = vsyncadd (%p2261_p13), [#allocation15], 4294966272  ;;  %p2262_p1 = pmov %p2259_p2 }
  0x82   : > { %1752 = dma.done.wait (%p2262_p1), [#allocation18], 512   ;;  %p2263_p7 = pmov %p2262_p1 }
  0x83   : > { %v1785_v0 = vmov 0   ;;  %v589_v1 = vld [vmem:[%s481_s11 + $0x18] sm:$0xff]  ;;  %v588_v2 = vld [vmem:[%s481_s11 + $0x10] sm:$0xff]  ;;  %v587_v3 = vld [vmem:[%s481_s11 + $0x8] sm:$0xff]  ;;  %vm590_vm0 = vcmask 261120   ;;  %s573_s29 = scalar_lea.vmem [#allocation19], %s2054_s22 }
  0x84   : > { %1754 = vsyncadd (%p2263_p7), [#allocation18], 4294966784  ;;  %1361 = vset.pattern.permute.xlu1 %v1785_v0  ;;  %1360 = vset.pattern.permute.xlu0 %v1785_v0  ;;  %v586_v4 = vld [vmem:[%s481_s11] sm:$0xff]  ;;  %v583_v5 = vld [vmem:[#allocation10 + $0x8] sm:$0xff]  ;;  %s1211_s25 = sshll.u32 %s1868_s20, 3  ;;  %s2268_s27 = sld [smem:[#allocation37_spill]] }
  0x85   : > { %1362 = vset.pattern.permute.xlu2 %v1785_v0  ;;  %1214 = vmatpush.msra.mxu1 %v589_v1  ;;  %v584_v6 = vld [vmem:[#allocation10 + $0x10] sm:$0xff]  ;;  %v581_v7 = vld [vmem:[%s2058_s17 + $0x18] sm:$0xff]  ;;  %v727_v9 = vld [vmem:[#allocation16 + $0x8] sm:$0xff]  ;;  %s972_s5 = sshll.u32 %s573_s29, 4  ;;  %s961_s3 = scalar_lea.sflag [#allocation4], %s2051_s0  ;;  %s973_s5 = int_to_ptr.vmem [resolvable:$true] %s972_s5 }
  0x86   : > { %1215 = vmatpush.msra.mxu2 %v589_v1  ;;  %615 = vmatpush.msra.mxu0 %v589_v1  ;;  %v2091_v8 = vld [vmem:[%s2071_s12 + $0x18] sm:$0xff]  ;;  %v580_v10 = vld [vmem:[%s2058_s17 + $0x10] sm:$0xff]  ;;  %v582_v12 = vld [vmem:[#allocation10] sm:$0xff] }
  0x87   : > { %1216 = vmatpush.msra.mxu3 %v589_v1  ;;  %1217 = vmatpush.msra.mxu1 %v588_v2  ;;  %v2097_v11 = vld [vmem:[%s2071_s12 + $0x10] sm:$0xff]  ;;  %v729_v13 = vld [vmem:[#allocation16 + $0x18] sm:$0xff]  ;;  %v579_v14 = vld [vmem:[%s2058_s17 + $0x8] sm:$0xff] }
  0x88   : > { %1218 = vmatpush.msra.mxu2 %v588_v2  ;;  %616 = vmatpush.msra.mxu0 %v588_v2  ;;  %v2102_v15 = vld [vmem:[%s2071_s12 + $0x8] sm:$0xff]  ;;  %v578_v16 = vld [vmem:[%s2058_s17] sm:$0xff]  ;;  %v585_v20 = vld [vmem:[#allocation10 + $0x18] sm:$0xff] }
  0x89   : > { %1219 = vmatpush.msra.mxu3 %v588_v2  ;;  %1220 = vmatpush.msra.mxu1 %v587_v3  ;;  %v2107_v17 = vld [vmem:[%s2071_s12] sm:$0xff]  ;;  %v728_v22 = vld [vmem:[#allocation16 + $0x10] sm:$0xff]  ;;  %v575_v23 = vld [vmem:[#allocation8 + $0x8] sm:$0xff] }
  0x8a   : > { %1221 = vmatpush.msra.mxu2 %v587_v3  ;;  %617 = vmatpush.msra.mxu0 %v587_v3  ;;  %v574_v18 = vld [vmem:[#allocation8] sm:$0xff]  ;;  %v674_v24 = vld [vmem:[#allocation11 + $0x8] sm:$0xff]  ;;  %v927_v25 = vld [vmem:[#allocation17 + $0x18] sm:$0xff]  ;;  %s971_s10 = scalar_lea.hbm %s2268_s27, %s1211_s25  ;;  %s1707_s23 = scalar_lea.hbm %s2268_s27, 64 }
  0x8b   : > { %1222 = vmatpush.msra.mxu3 %v587_v3  ;;  %1223 = vmatpush.msra.mxu1 %v586_v4  ;;  %v673_v19 = vld [vmem:[#allocation11] sm:$0xff]  ;;  %v926_v26 = vld [vmem:[#allocation17 + $0x10] sm:$0xff]  ;;  %v676_v29 = vld [vmem:[#allocation11 + $0x18] sm:$0xff]  ;;  %s974_s26 = sshll.u32 %s971_s10, 4  ;;  %s975_s26 = int_to_ptr.hbm [resolvable:$true] %s974_s26 }
  0x8c   : > { %1224 = vmatpush.msra.mxu2 %v586_v4  ;;  %1187 = vmatmul.msk.f32.vlgmr.msra.gmra.mxu1 %vm590_vm0, %v583_v5  ;;  %v726_v21 = vld [vmem:[#allocation16] sm:$0xff]  ;;  %v576_v27 = vld [vmem:[#allocation8 + $0x10] sm:$0xff]  ;;  %v577_v30 = vld [vmem:[#allocation8 + $0x18] sm:$0xff]  ;;  %s1701_s16 = sshra.s32 %s975_s26, 4  ;;  %s1702_s16 = int_to_ptr.hbm [resolvable:$true] %s1701_s16 }
  0x8d   : > { %1188 = vmatmul.msk.f32.vlgmr.msra.gmra.mxu2 %vm590_vm0, %v584_v6  ;;  %656 = vmatpush.msrb.mxu1 %v581_v7  ;;  %v675_v28 = vld [vmem:[#allocation11 + $0x10] sm:$0xff]  ;;  %v834_v5 = vld [vmem:[#allocation13] sm:$0xff]  ;;  %s1703_s20 = scalar_lea.hbm %s1702_s16, 32  ;;  %p1708_p12 = scmp.lt.s32.totalorder %s1702_s16, %s2268_s27 }
  0x8e   : > { %705 = vmatpush.msrb.mxu2 %v2091_v8  ;;  %618 = vmatpush.msra.mxu0 %v586_v4  ;;  %p1704_p10 = scmp.ne.s32.totalorder %s1702_s16, %s1703_s20  ;;  %p1709_p3 = scmp.lt.s32.totalorder %s1707_s23, %s1703_s20 }
  0x8f   : > { %737 = vperm.xlu1 %1361, %v727_v9   ;;  %657 = vmatpush.msrb.mxu1 %v580_v10 }
  0x90   : > { %706 = vmatpush.msrb.mxu2 %v2097_v11  ;;  %1186 = vmatmul.msk.f32.vlgmr.msra.gmra.mxu0 %vm590_vm0, %v582_v12  ;;  %p1705_p6 = pnand %p1704_p10, %p1929_p0  ;;  %p1710_p8 = por %p1709_p3, %p1708_p12 }
  0x91   : > { %747 = vperm.xlu0 %1360, %v729_v13   ;;  %658 = vmatpush.msrb.mxu1 %v579_v14 }
  0x92   : > { %707 = vmatpush.msrb.mxu2 %v2102_v15  ;;  %1225 = vmatpush.msra.mxu3 %v586_v4  ;;  %p1706_p11 = pneg %p1705_p6 }
  0x93   : > { %907 = vmatpush.msrb.mxu0 %v581_v7  ;;  %659 = vmatpush.msrb.mxu1 %v578_v16 }
  0x94   : > { %708 = vmatpush.msrb.mxu2 %v2107_v17  ;;  %1190 = vmatmul.msk.f32.vlgmr.msrb.gmra.mxu1 %vm590_vm0, %v574_v18  ;;  %p1711_p9 = pnand %p1710_p8, %p1706_p11 }
  0x95   : > { %1194 = vmatmul.msk.f32.vlgmr.msrb.gmra.mxu2 %vm590_vm0, %v673_v19  ;;  %1189 = vmatmul.msk.f32.vlgmr.msra.gmra.mxu3 %vm590_vm0, %v585_v20  ;;  %v835_v19 = vld [vmem:[#allocation13 + $0x8] sm:$0xff] }
  0x96   : > { %908 = vmatpush.msrb.mxu0 %v580_v10 }
  0x97   : > { %732 = vperm.xlu1 %1361, %v726_v21  }
  0x98   : > { %909 = vmatpush.msrb.mxu0 %v579_v14 }
  0x99   : > { %742 = vperm.xlu0 %1360, %v728_v22  }
  0x9a   : > { %910 = vmatpush.msrb.mxu0 %v578_v16 }
  0x9b   : > { %1206 = vmatmul.msk.f32.vlgmr.msrb.gmra.mxu0 %vm590_vm0, %v834_v5 }
  0x9c   : > { %1191 = vmatmul.msk.f32.gmra.mxu1 %vm590_vm0, %v575_v23 }
  0x9d   : > { %1195 = vmatmul.msk.f32.gmra.mxu2 %vm590_vm0, %v674_v24 }
  0x9f   : > { %945 = vperm.xlu1 %1361, %v927_v25  }
  0xa1   : > { %940 = vperm.xlu0 %1360, %v926_v26  }
  0xa3   : > { %1207 = vmatmul.msk.f32.gmra.mxu0 %vm590_vm0, %v835_v19 }
  0xa4   : > { %1192 = vmatmul.msk.f32.gmra.mxu1 %vm590_vm0, %v576_v27 }
  0xa5   : > { %1196 = vmatmul.msk.f32.gmra.mxu2 %vm590_vm0, %v675_v28 }
  0xac   : > { %1193 = vmatmul.msk.f32.gmra.mxu1 %vm590_vm0, %v577_v30 }
  0xad   : > { %1197 = vmatmul.msk.f32.gmra.mxu2 %vm590_vm0, %v676_v29 }
 0x101   : > { %v738_v34 = vpop.permute.xlu1 %737 }
 0x103   : > { %v748_v42 = vpop.permute.xlu0 %747 }
 0x109   : > { %v623_v31 = vpop.f32.mrf.mxu1  ;;  %v733_v40 = vpop.permute.xlu1 %732 }
 0x10b   : > { %v743_v52 = vpop.permute.xlu0 %742 }
 0x10d   : > { %v620_v35 = vpop.f32.mrf.mxu0 }
 0x110   : > { %v626_v32 = vpop.f32.mrf.mxu2 }
 0x111   : > { %v661_v33 = vpop.f32.mrf.mxu1 }
 0x112   : > { %v662_v36 = vadd.f32 %v661_v33, %v620_v35 }
 0x118   : > { %v710_v37 = vpop.f32.mrf.mxu2  ;;  %v629_v54 = vpop.f32.mrf.mxu3 }
 0x119   : > { %v664_v38 = vpop.f32.mrf.mxu1  ;;  %v722_v39 = vadd.f32 %v710_v37, %v662_v36 }
 0x11a   : > { %v665_v41 = vadd.f32 %v664_v38, %v623_v31 }
 0x11b   : > { %v750_v43 = vadd.f32 %v733_v40, %v722_v39 }
 0x11d   : > { %v1198_v48 = vmul.f32 -1.442695, %v750_v43 }
 0x11f   : > { %1363 = vpow2.f32 %v1198_v48 }
 0x120   : > { %v713_v44 = vpop.f32.mrf.mxu2 }
 0x121   : > { %v723_v45 = vadd.f32 %v713_v44, %v665_v41  ;;  %v667_v46 = vpop.f32.mrf.mxu1 }
 0x122   : > { %v668_v50 = vadd.f32 %v667_v46, %v626_v32  ;;  %v836_v32 = vld [vmem:[#allocation13 + $0x10] sm:$0xff] }
 0x123   : > { %v751_v47 = vadd.f32 %v738_v34, %v723_v45  ;;  %1208 = vmatmul.msk.f32.gmra.mxu0 %vm590_vm0, %v836_v32 }
 0x125   : > { %v1199_v49 = vmul.f32 -1.442695, %v751_v47  ;;  %v1364_v59 = vpop.eup %1363 }
 0x126   : > { %v2121_v62 = vadd.f32 1.0, %v1364_v59 }
 0x127   : > { %1365 = vpow2.f32 %v1199_v49 }
 0x128   : > { %v716_v51 = vpop.f32.mrf.mxu2  ;;  %vm775_vm1 = vweird.f32 %v2121_v62  ;;  %v779_v45 = vand.u32 2147483647, %v2121_v62  ;;  %v781_v46 = vand.u32 2147483648, %v2121_v62 }
 0x129   : > { %v724_v53 = vadd.f32 %v716_v51, %v668_v50  ;;  %v670_v55 = vpop.f32.mrf.mxu1 }
 0x12a   : > { %v671_v58 = vadd.f32 %v670_v55, %v629_v54  ;;  %v782_v55 = vor.u32 1.1754944e-38, %v781_v46 }
 0x12b   : > { %v752_v56 = vadd.f32 %v743_v52, %v724_v53 }
 0x12d   : > { %v1200_v57 = vmul.f32 -1.442695, %v752_v56  ;;  %v1366_v60 = vpop.eup %1365  ;;  %v837_v56 = vld [vmem:[#allocation13 + $0x18] sm:$0xff] }
 0x12e   : > { %v2123_v0 = vadd.f32 1.0, %v1366_v60  ;;  %1209 = vmatmul.msk.f32.gmra.mxu0 %vm590_vm0, %v837_v56 }
 0x12f   : > { %1367 = vpow2.f32 %v1200_v57  ;;  %v924_v57 = vld [vmem:[#allocation17] sm:$0xff] }
 0x130   : > { %v719_v61 = vpop.f32.mrf.mxu2  ;;  %1369 = vrcp.f32 %v2121_v62  ;;  %vm790_vm7 = vweird.f32 %v2123_v0  ;;  %v794_v37 = vand.u32 2147483647, %v2123_v0  ;;  %v796_v38 = vand.u32 2147483648, %v2123_v0  ;;  %930 = vperm.xlu2 %1362, %v924_v57  }
 0x131   : > { %v725_v63 = vadd.f32 %v719_v61, %v671_v58  ;;  %1371 = vrcp.f32 %v2123_v0  ;;  %v838_v61 = vld [vmem:[#allocation14] sm:$0xff] }
 0x132   : > { %v797_v51 = vor.u32 1.1754944e-38, %v796_v38  ;;  %vm795_vm15 = vcmp.eq.f32.partialorder %v794_v37, 8.507059e+37 }
 0x133   : > { %v753_v1 = vadd.f32 %v748_v42, %v725_v63  ;;  %v839_v63 = vld [vmem:[#allocation14 + $0x8] sm:$0xff] }
 0x135   : > { %v1368_v2 = vpop.eup %1367  ;;  %v1201_v3 = vmul.f32 -1.442695, %v753_v1 }
 0x136   : > { %v768_v4 = vadd.f32 1.0, %v1368_v2  ;;  %v2127_v6 = vpop.eup %1369 }
 0x137   : > { %1373 = vpow2.f32 %v1201_v3  ;;  %v1372_v7 = vpop.eup %1371  ;;  %v771_v16 = vmul.f32 %v2127_v6, %v2121_v62  ;;  %vm776_vm8 = vweird.f32 %v2127_v6  ;;  %v925_v62 = vld [vmem:[#allocation17 + $0x8] sm:$0xff] }
 0x138   : > { %1375 = vrcp.f32 %v768_v4  ;;  %v786_v14 = vmul.f32 %v1372_v7, %v2123_v0  ;;  %vm791_vm3 = vweird.f32 %v1372_v7  ;;  %vm805_vm4 = vweird.f32 %v768_v4  ;;  %vm777_vm14 = vmor %vm775_vm1, %vm776_vm8  ;;  %935 = vperm.xlu2 %1362, %v925_v62   ;;  %v841_v0 = vld [vmem:[#allocation14 + $0x18] sm:$0xff] }
 0x139   : > { %v772_v21 = vsub.f32 1.0, %v771_v16  ;;  %v809_v30 = vand.u32 2147483647, %v768_v4  ;;  %v811_v31 = vand.u32 2147483648, %v768_v4  ;;  %vm2148_vm10 = vmor %vm790_vm7, %vm791_vm3  ;;  %v941_v16 = vpop.permute.xlu0 %940 }
 0x13a   : > { %v787_v20 = vsub.f32 1.0, %v786_v14 }
 0x13b   : > { %v773_v26 = vmul.f32 %v2127_v6, %v772_v21  ;;  %v812_v44 = vor.u32 1.1754944e-38, %v811_v31  ;;  %vm810_vm13 = vcmp.eq.f32.partialorder %v809_v30, 8.507059e+37 }
 0x13c   : > { %v788_v25 = vmul.f32 %v1372_v7, %v787_v20 }
 0x13d   : > { %v1374_v9 = vpop.eup %1373  ;;  %v774_v42 = vadd.f32 %v2127_v6, %v773_v26 }
 0x13e   : > { %v1376_v10 = vpop.eup %1375  ;;  %v769_v12 = vadd.f32 1.0, %v1374_v9  ;;  %v789_v35 = vadd.f32 %v1372_v7, %v788_v25 }
 0x13f   : > { %v801_v13 = vmul.f32 %v1376_v10, %v768_v4  ;;  %vm806_vm2 = vweird.f32 %v1376_v10  ;;  %v778_v53 = vsel %vm777_vm14, %v2127_v6, %v774_v42 }
 0x140   : > { %1377 = vrcp.f32 %v769_v12  ;;  %v826_v29 = vand.u32 2147483648, %v769_v12  ;;  %v824_v34 = vand.u32 2147483647, %v769_v12  ;;  %vm2137_vm6 = vmor %vm805_vm4, %vm806_vm2  ;;  %vm820_vm9 = vweird.f32 %v769_v12 }
 0x141   : > { %v802_v18 = vsub.f32 1.0, %v801_v13  ;;  %v793_v48 = vsel %vm2148_vm10, %v1372_v7, %v789_v35  ;;  %vm780_vm2 = vcmp.eq.f32.partialorder %v779_v45, 8.507059e+37 }
 0x142   : > { %v827_v43 = vor.u32 1.1754944e-38, %v826_v29  ;;  %vm825_vm12 = vcmp.eq.f32.partialorder %v824_v34, 8.507059e+37  ;;  %v798_v54 = vsel %vm795_vm15, %v797_v51, %v793_v48  ;;  %v783_v59 = vsel %vm780_vm2, %v782_v55, %v778_v53 }
 0x143   : > { %v803_v22 = vmul.f32 %v1376_v10, %v802_v18  ;;  %v831_v60 = vmul.f32 %v798_v54, %v2102_v15  ;;  %v912_v15 = vpop.f32.mrf.mxu0 }
 0x145   : > { %v804_v28 = vadd.f32 %v1376_v10, %v803_v22 }
 0x146   : > { %v1378_v23 = vpop.eup %1377 }
 0x147   : > { %v816_v24 = vmul.f32 %v1378_v23, %v769_v12  ;;  %vm821_vm5 = vweird.f32 %v1378_v23  ;;  %v808_v40 = vsel %vm2137_vm6, %v1376_v10, %v804_v28 }
 0x148   : > { %vm822_vm11 = vmor %vm820_vm9, %vm821_vm5  ;;  %v813_v50 = vsel %vm810_vm13, %v812_v44, %v808_v40 }
 0x149   : > { %v817_v27 = vsub.f32 1.0, %v816_v24  ;;  %v832_v58 = vmul.f32 %v813_v50, %v2097_v11  ;;  %v840_v11 = vld [vmem:[#allocation14 + $0x10] sm:$0xff] }
 0x14b   : > { %v818_v33 = vmul.f32 %v1378_v23, %v817_v27  ;;  %v915_v3 = vpop.f32.mrf.mxu0 }
 0x14d   : > { %v819_v39 = vadd.f32 %v1378_v23, %v818_v33 }
 0x14f   : > { %v823_v47 = vsel %vm822_vm11, %v1378_v23, %v819_v39  ;;  %v946_v23 = vpop.permute.xlu1 %945 }
 0x150   : > { %v828_v49 = vsel %vm825_vm12, %v827_v43, %v823_v47 }
 0x151   : > { %v833_v52 = vmul.f32 %v828_v49, %v2091_v8  ;;  %v830_v8 = vmul.f32 %v783_v59, %v2107_v17 }
 0x153   : > { %866 = vmatpush.msrb.mxu3 %v833_v52 }
 0x155   : > { %867 = vmatpush.msrb.mxu3 %v832_v58 }
 0x157   : > { %868 = vmatpush.msrb.mxu3 %v831_v60 }
 0x159   : > { %869 = vmatpush.msrb.mxu3 %v830_v8 }
 0x15a   : > { %1202 = vmatmul.msk.f32.vlgmr.msrb.gmra.mxu3 %vm590_vm0, %v838_v61 }
 0x162   : > { %1203 = vmatmul.msk.f32.gmra.mxu3 %vm590_vm0, %v839_v63 }
 0x16a   : > { %1204 = vmatmul.msk.f32.gmra.mxu3 %vm590_vm0, %v840_v11 }
 0x172   : > { %1205 = vmatmul.msk.f32.gmra.mxu3 %vm590_vm0, %v841_v0 }
 0x18a   : > { %v931_v1 = vpop.permute.xlu2 %930 }
 0x192   : > { %v936_v6 = vpop.permute.xlu2 %935 }
 0x1a0   : > { %v918_v12 = vpop.f32.mrf.mxu0 }
 0x1ab   : > { %v921_v20 = vpop.f32.mrf.mxu0 }
 0x1dd   : > { %v871_v2 = vpop.f32.mrf.mxu3 }
 0x1de   : > { %v913_v17 = vadd.f32 %v912_v15, %v871_v2 }
 0x1e0   : > { %v948_v4 = vadd.f32 %v931_v1, %v913_v17 }
 0x1e2   : > { %1379 = vtanh.f32 %v948_v4 }
 0x1e5   : > { %v874_v5 = vpop.f32.mrf.mxu3 }
 0x1e6   : > { %v916_v7 = vadd.f32 %v915_v3, %v874_v5 }
 0x1e8   : > { %v1380_v9 = vpop.eup %1379  ;;  %v949_v10 = vadd.f32 %v936_v6, %v916_v7 }
 0x1e9   : > { %956 = vst [vmem:[%s573_s29] sm:$0xff] %v1380_v9 }
 0x1ea   : > { %1381 = vtanh.f32 %v949_v10 }
 0x1ed   : > { %v877_v13 = vpop.f32.mrf.mxu3 }
 0x1ee   : > { %v919_v14 = vadd.f32 %v918_v12, %v877_v13 }
 0x1f0   : > { %v1382_v18 = vpop.eup %1381  ;;  %v950_v19 = vadd.f32 %v941_v16, %v919_v14 }
 0x1f1   : > { %957 = vst [vmem:[%s573_s29 + $0x8] sm:$0xff] %v1382_v18 }
 0x1f2   : > { %1383 = vtanh.f32 %v950_v19 }
 0x1f5   : > { %v880_v21 = vpop.f32.mrf.mxu3 }
 0x1f6   : > { %v922_v22 = vadd.f32 %v921_v20, %v880_v21 }
 0x1f8   : > { %v1384_v24 = vpop.eup %1383  ;;  %v951_v25 = vadd.f32 %v946_v23, %v922_v22 }
 0x1f9   : > { %958 = vst [vmem:[%s573_s29 + $0x10] sm:$0xff] %v1384_v24 }
 0x1fa   : > { %1385 = vtanh.f32 %v951_v25 }
 0x200   : > { %v1386_v26 = vpop.eup %1385 }
 0x201   : > { %959 = vst [vmem:[%s573_s29 + $0x18] sm:$0xff] %v1386_v26 }
 0x202   : > { %1714 = shalt.err (!%p1711_p9)
}
 0x203   : > { %s1786_s0 = smov 128   ;;  %s1787_s24 = smov 256  }
 0x204   : > { %s1788_s17 = smov 8  }
 0x205   : > { %1260 = dma.vmem_to_hbm [thread:$0]  (%p1929_p0), %s973_s5, 512, %s975_s26, %s961_s3, %s1786_s0, %s1787_s24, %s1788_s17  }
 0x206 PF: > { %s2269_s13 = sld [smem:[#allocation27_spill]] }
 0x207   : > { %s2271_s11 = sld [smem:[#allocation28_spill]] }
 0x20c   : > { %s989_s12 = sand.u32 1, %s2269_s13  }
 0x20d   : > { %p2272_p2 = scmp.ge.s32.totalorder %s2271_s11, 2  ;;  %s990_s29 = scalar_lea.sflag [#allocation4], %s989_s12 }
 0x20f   : > { %p1295_p4 = pnand %p2272_p2, %p1935_p5 }
 0x211   : > { %p1296_p13 = pneg %p1295_p4 }
 0x213   : > { %1756 = dma.done.wait (%p1296_p13), %s990_s29, 512  }
 0x214   : > { %1758 = vsyncadd (%p1296_p13), %s990_s29, 4294966784  ;;  %s2273_s16 = sld [smem:[#allocation29_spill]]  ;;  %s2275_s13 = smov %s1765_s14 }
 0x215   : > { %s2274_s25 = sld [smem:[#allocation30_spill]]  ;;  %s2276_s14 = smov %s1769_s15 }
 0x21a   : > { %p30_p1 = scmp.ge.s32.totalorder %s2273_s16, 4  }
 0x21b   : > { %s2277_s15 = smov %s2274_s25 }
 0x21c   :  { %32 = sbr.rel (!%p30_p1) target bundleno = 18 (0x12), region = 157 }
 0x221   :  { %996 = vsyncpa [#allocation3], 1 }
 0x222   :  { %998 = vsyncpa [#allocation3 + $0x1], 1 }
 0x223   :  { %999 = vsyncpa [#allocation6], 1 }
 0x224   :  { %1001 = vsyncpa [#allocation6 + $0x1], 1 }
 0x225   :  { %1002 = vsyncpa [#allocation9], 1 }
 0x226   :  { %1003 = vsyncpa [#allocation12], 1 }
 0x227   :  { %1004 = vsyncpa [#allocation15], 1 }
 0x228   :  { %1005 = vsyncpa [#allocation18], 1 }
 0x229   :  { %1006 = vsyncpa [#allocation4], 1 }
 0x22a   :  { %1008 = vsyncpa [#allocation4 + $0x1], 1 }

</bundles_post_ra>
